<compile_context>
chip_gen: v7x
topology: tpu7x:2x2x1
jax: 0.10.0
libtpu: 0.0.40
codegen_flags: <defaults>
</compile_context>

<pallas_src>
import jax
import jax.numpy as jnp
from jax import lax
from jax.experimental import pallas as pl
from jax.experimental.pallas import tpu as pltpu


# ----------------------------- budgeting helpers ------------------------------
def _vmem_budget_bytes():
    """~3/4 of physical VMEM: ~48 MiB on v7x, ~96 MiB on v5e/v6e."""
    try:
        cap = int(pltpu.get_tpu_info().vmem_capacity_bytes)
    except Exception:  # no TPU visible / interpret mode / older runtime
        cap = 64 * 1024 * 1024
    return (cap * 3) // 4


def _pick_tile_n(N, C, itemsize, budget):
    """Spatial tile width derived from the VMEM budget.

    Per grid step ~4 double-buffered (1, C, tN) blocks (pass 2: x in, out,
    plus pass-1 row/col operands) and the resident (C, C) blocks.
    """
    fixed = 3 * C * C * 4                        # f32 scratch + resident attn
    avail = max(budget - fixed, 4 * C * itemsize * 128)
    t = avail // (4 * C * itemsize)
    t = (t // 256) * 256 if t >= 256 else 128    # prefer 256-aligned (v6e/v7x MXU)
    t = max(t, 128)
    n_pad128 = ((N + 127) // 128) * 128          # no point exceeding padded extent
    return min(t, n_pad128)


def _pick_tile_c(C):
    """Row tile for pass 1: second parallel grid axis (keeps both v7x
    TensorCores busy when B is small) + smaller resident accumulator."""
    if C >= 512 and C % 256 == 0:
        return 256
    return C


def _scaled_softmax(gamma, e):
    # softmax(rowmax(E) - E) == exp(rowmin(E) - E) / rowsum : single reduction.
    p = jnp.exp(jnp.min(e, axis=-1, keepdims=True) - e)
    rowsum = jnp.sum(p, axis=-1, keepdims=True)            # >= 1, stable
    # Exact divide (runs once per (row-tile, batch)); gamma folded into the
    # attention scale so pass 2 needs no extra (C, N) multiply.
    return p * (gamma / rowsum)


# ---------------- pass 1: accumulate energy over N tiles, finalize ------------
def _cam_attn_kernel(gamma_ref, x_ref, attn_ref, acc_ref):
    # gamma_ref: SMEM (1,) f32
    # x_ref:     VMEM (1, C, tN)  native dtype
    # attn_ref:  VMEM (1, C, C)   x.dtype output, written only at finalize
    # acc_ref:   VMEM (C, C) f32  scratch accumulator, resident across N tiles
    n = pl.program_id(1)

    @pl.when(n == 0)
    def _init():
        acc_ref[...] = jnp.zeros_like(acc_ref)

    xt = x_ref[0]                                       # (C, tN) straight to MXU
    acc_ref[...] += lax.dot_general(                    # E += xt @ xt^T, f32 acc
        xt, xt, (((1,), (1,)), ((), ())),
        preferred_element_type=jnp.float32)

    @pl.when(n == pl.num_programs(1) - 1)
    def _finalize():
        attn_ref[0] = _scaled_softmax(gamma_ref[0],
                                      acc_ref[...]).astype(attn_ref.dtype)


def _cam_attn_rows_kernel(gamma_ref, xrow_ref, xcol_ref, attn_ref, acc_ref):
    # Row-tiled variant: grid (B, C/tC, N/tN).
    # xrow_ref: (1, tC, tN) row slab;  xcol_ref: (1, C, tN) all rows.
    n = pl.program_id(2)

    @pl.when(n == 0)
    def _init():
        acc_ref[...] = jnp.zeros_like(acc_ref)

    acc_ref[...] += lax.dot_general(
        xrow_ref[0], xcol_ref[0], (((1,), (1,)), ((), ())),
        preferred_element_type=jnp.float32)

    @pl.when(n == pl.num_programs(2) - 1)
    def _finalize():
        attn_ref[0] = _scaled_softmax(gamma_ref[0],
                                      acc_ref[...]).astype(attn_ref.dtype)


# ---------------- pass 2: out_tile = attn_scaled @ x_tile + x_tile ------------
def _cam_apply_kernel(attn_ref, x_ref, o_ref):
    xv = x_ref[0]                                            # (C, tN) native dtype
    acc = jnp.dot(attn_ref[0], xv, preferred_element_type=jnp.float32)
    # Residual add in f32, single rounding to the output dtype.
    o_ref[0] = (acc + xv.astype(jnp.float32)).astype(o_ref.dtype)


# ----------------------------------- wrapper ----------------------------------
def cam_forward(x, gamma, tile_n=None, tile_c=None):
    """x: (B, C, H, W), gamma: (1,) -> (B, C, H, W)."""
    B, C, H, W = x.shape
    N = H * W
    itemsize = x.dtype.itemsize
    budget = _vmem_budget_bytes()

    if tile_n is None:
        tile_n = _pick_tile_n(N, C, itemsize, budget)
    if tile_c is None:
        tile_c = _pick_tile_c(C)
    assert C % tile_c == 0

    n_tiles = -(-N // tile_n)
    N_pad = n_tiles * tile_n

    xr = x.reshape(B, C, N)
    if N_pad != N:
        # Zero columns contribute nothing to E or to attn @ x -> exact.
        xr = jnp.pad(xr, ((0, 0), (0, 0), (0, N_pad - N)))

    gamma = gamma.reshape(1).astype(jnp.float32)

    attn_bytes = B * C * C * itemsize
    x_bytes = B * C * N_pad * itemsize
    cost1 = pl.CostEstimate(flops=2 * B * C * C * N_pad,
                            transcendentals=B * C * C,
                            bytes_accessed=x_bytes + attn_bytes)
    cost2 = pl.CostEstimate(flops=2 * B * C * C * N_pad + B * C * N_pad,
                            transcendentals=0,
                            bytes_accessed=2 * x_bytes + attn_bytes)

    # ---- pass 1: attn_scaled = gamma * softmax(-(x @ x^T)), in x.dtype -------
    if tile_c == C:
        attn = pl.pallas_call(
            _cam_attn_kernel,
            out_shape=jax.ShapeDtypeStruct((B, C, C), x.dtype),
            grid=(B, n_tiles),
            in_specs=[
                pl.BlockSpec(memory_space=pltpu.SMEM),                  # gamma
                pl.BlockSpec((1, C, tile_n), lambda b, n: (b, 0, n)),   # x tile
            ],
            out_specs=pl.BlockSpec((1, C, C), lambda b, n: (b, 0, 0)),
            scratch_shapes=[pltpu.VMEM((C, C), jnp.float32)],
            compiler_params=pltpu.CompilerParams(
                dimension_semantics=("parallel", "arbitrary"),
                vmem_limit_bytes=budget),
            cost_estimate=cost1,
        )(gamma, xr)
    else:
        attn = pl.pallas_call(
            _cam_attn_rows_kernel,
            out_shape=jax.ShapeDtypeStruct((B, C, C), x.dtype),
            grid=(B, C // tile_c, n_tiles),
            in_specs=[
                pl.BlockSpec(memory_space=pltpu.SMEM),                          # gamma
                pl.BlockSpec((1, tile_c, tile_n), lambda b, i, n: (b, i, n)),   # rows
                pl.BlockSpec((1, C, tile_n), lambda b, i, n: (b, 0, n)),        # cols
            ],
            out_specs=pl.BlockSpec((1, tile_c, C), lambda b, i, n: (b, i, 0)),
            scratch_shapes=[pltpu.VMEM((tile_c, C), jnp.float32)],
            compiler_params=pltpu.CompilerParams(
                dimension_semantics=("parallel", "parallel", "arbitrary"),
                vmem_limit_bytes=budget),
            cost_estimate=cost1,
        )(gamma, xr, xr)

    # ---- pass 2: out = attn_scaled @ x + x, parallel over (B, N tiles) -------
    out = pl.pallas_call(
        _cam_apply_kernel,
        out_shape=jax.ShapeDtypeStruct((B, C, N_pad), x.dtype),
        grid=(B, n_tiles),
        in_specs=[
            pl.BlockSpec((1, C, C), lambda b, n: (b, 0, 0)),        # attn (resident)
            pl.BlockSpec((1, C, tile_n), lambda b, n: (b, 0, n)),   # x tile
        ],
        out_specs=pl.BlockSpec((1, C, tile_n), lambda b, n: (b, 0, n)),
        compiler_params=pltpu.CompilerParams(
            dimension_semantics=("parallel", "parallel"),
            vmem_limit_bytes=budget),
        cost_estimate=cost2,
    )(attn, xr)

    if N_pad != N:
        out = out[:, :, :N]
    return out.reshape(B, C, H, W)


def cam_reference(x, gamma):
    """Pure-JAX reference mirroring the PyTorch forward."""
    B, C, H, W = x.shape
    q = x.reshape(B, C, -1)
    energy = jnp.einsum("bcn,bdn->bcd", q, q)
    energy_new = jnp.max(energy, axis=-1, keepdims=True) - energy
    attn = jax.nn.softmax(energy_new, axis=-1)
    out = jnp.einsum("bcd,bdn->bcn", attn, q).reshape(B, C, H, W)
    return gamma[0] * out + x


if __name__ == "__main__":
    key = jax.random.PRNGKey(0)

    # Module __init__ sets gamma = zeros(1); use a nonzero value so the
    # attention path is actually exercised.
    gamma = jnp.full((1,), 0.5, dtype=jnp.float32)

    B, C, H, W = 2, 4, 16, 16
    x = jax.random.normal(key, (B, C, H, W), dtype=jnp.float32)

    # tile_n=128 -> 2 spatial tiles, exercising the resident-accumulator axis.
    out = jax.block_until_ready(cam_forward(x, gamma, tile_n=128))
    ref = cam_reference(x, gamma)
    assert out.shape == (B, C, H, W)
    err = float(jnp.max(jnp.abs(out - ref)))
    assert jnp.allclose(out, ref, atol=2e-3, rtol=2e-3), (
        f"mismatch vs reference: max abs err {err}")

    # Non-multiple-of-128 spatial size exercises the zero-padding path with
    # auto-derived tile_n / VMEM budget.
    x2 = jax.random.normal(jax.random.PRNGKey(1), (1, 4, 12, 12), dtype=jnp.float32)
    out2 = jax.block_until_ready(cam_forward(x2, gamma))
    ref2 = cam_reference(x2, gamma)
    err2 = float(jnp.max(jnp.abs(out2 - ref2)))
    assert jnp.allclose(out2, ref2, atol=2e-3, rtol=2e-3), (
        f"mismatch (padded path): max abs err {err2}")

    print("KERNEL_OK")
</pallas_src>

<mosaic_0001>
module attributes {stable_mosaic.version = 11 : i64} {
  func.func @_cam_attn_kernel(%arg0: i32, %arg1: i32, %arg2: memref<1xf32, #tpu.memory_space<smem>>, %arg3: memref<1x4x128xf32, #tpu.memory_space<vmem>>, %arg4: memref<1x4x4xf32, #tpu.memory_space<vmem>>, %arg5: memref<4x4xf32, #tpu.memory_space<vmem>>) attributes {dimension_semantics = [#tpu.dimension_semantics<parallel>, #tpu.dimension_semantics<arbitrary>], iteration_bounds = array<i64: 2, 2>, scalar_prefetch = 0 : i64, scratch_operands = 1 : i64, tpu.core_type = #tpu.core_type<tc>, window_params = [{transform_indices = @transform_0, window_bounds = array<i64: 1>}, {transform_indices = @transform_1, window_bounds = array<i64: 1, 4, 128>}, {transform_indices = @transform_2, window_bounds = array<i64: 1, 4, 4>}]} {
    %c0_i32 = arith.constant 0 : i32
    %0 = arith.cmpi eq, %arg1, %c0_i32 : i32
    %1 = arith.extui %0 : i1 to i32
    %c0_i32_0 = arith.constant 0 : i32
    %2 = arith.cmpi ne, %1, %c0_i32_0 : i32
    scf.if %2 {
      %cst_8 = arith.constant 0.000000e+00 : f32
      %12 = vector.broadcast %cst_8 : f32 to vector<4x4xf32>
      %c0_9 = arith.constant 0 : index
      %c0_10 = arith.constant 0 : index
      %13 = vector.load %arg5[%c0_9, %c0_10] : memref<4x4xf32, #tpu.memory_space<vmem>>, vector<4x4xf32>
      tpu.vector_store %arg5[%c0_9, %c0_10], %12 {strides = array<i32>} : memref<4x4xf32, #tpu.memory_space<vmem>>, vector<4x4xf32>,
    } else {
    }
    %c0 = arith.constant 0 : index
    %c0_1 = arith.constant 0 : index
    %c0_2 = arith.constant 0 : index
    %3 = vector.load %arg3[%c0, %c0_1, %c0_2] : memref<1x4x128xf32, #tpu.memory_space<vmem>>, vector<1x4x128xf32>
    %4 = vector.shape_cast %3 : vector<1x4x128xf32> to vector<4x128xf32>
    %c0_3 = arith.constant 0 : index
    %c0_4 = arith.constant 0 : index
    %5 = vector.load %arg5[%c0_3, %c0_4] : memref<4x4xf32, #tpu.memory_space<vmem>>, vector<4x4xf32>
    %cst = arith.constant dense<0.000000e+00> : vector<4x4xf32>
    %6 = tpu.matmul %4, %4, %cst {dimension_numbers = #tpu.dot_dimension_numbers<[1], [1], [0], [0], [0, 0, 1, 0], [], []>} : vector<4x128xf32>, vector<4x128xf32>, vector<4x4xf32> -> vector<4x4xf32>
    %7 = arith.addf %5, %6 : vector<4x4xf32>
    %c0_5 = arith.constant 0 : index
    %c0_6 = arith.constant 0 : index
    %8 = vector.load %arg5[%c0_5, %c0_6] : memref<4x4xf32, #tpu.memory_space<vmem>>, vector<4x4xf32>
    tpu.vector_store %arg5[%c0_5, %c0_6], %7 {strides = array<i32>} : memref<4x4xf32, #tpu.memory_space<vmem>>, vector<4x4xf32>,
    %c1_i32 = arith.constant 1 : i32
    %9 = arith.cmpi eq, %arg1, %c1_i32 : i32
    %10 = arith.extui %9 : i1 to i32
    %c0_i32_7 = arith.constant 0 : i32
    %11 = arith.cmpi ne, %10, %c0_i32_7 : i32
    scf.if %11 {
      %c0_8 = arith.constant 0 : index
      %12 = memref.load %arg2[%c0_8] : memref<1xf32, #tpu.memory_space<smem>>
      %c0_9 = arith.constant 0 : index
      %c0_10 = arith.constant 0 : index
      %13 = vector.load %arg5[%c0_9, %c0_10] : memref<4x4xf32, #tpu.memory_space<vmem>>, vector<4x4xf32>
      %cst_11 = arith.constant dense<0x7F800000> : vector<4xf32>
      %14 = vector.multi_reduction <minimumf>, %13, %cst_11 [1] : vector<4x4xf32> to vector<4xf32>
      %15 = vector.shape_cast %14 : vector<4xf32> to vector<4x1xf32>
      %16 = vector.broadcast %15 : vector<4x1xf32> to vector<4x4xf32>
      %17 = arith.subf %16, %13 : vector<4x4xf32>
      %18 = math.exp %17 : vector<4x4xf32>
      %cst_12 = arith.constant dense<0.000000e+00> : vector<4xf32>
      %19 = vector.multi_reduction <add>, %18, %cst_12 [1] : vector<4x4xf32> to vector<4xf32>
      %20 = vector.shape_cast %19 : vector<4xf32> to vector<4x1xf32>
      %21 = vector.broadcast %12 : f32 to vector<4x1xf32>
      %22 = arith.divf %21, %20 : vector<4x1xf32>
      %23 = vector.broadcast %22 : vector<4x1xf32> to vector<4x4xf32>
      %24 = arith.mulf %18, %23 : vector<4x4xf32>
      %c0_13 = arith.constant 0 : index
      %c0_14 = arith.constant 0 : index
      %c0_15 = arith.constant 0 : index
      %25 = vector.load %arg4[%c0_13, %c0_14, %c0_15] : memref<1x4x4xf32, #tpu.memory_space<vmem>>, vector<1x4x4xf32>
      %26 = vector.shape_cast %25 : vector<1x4x4xf32> to vector<4x4xf32>
      %27 = vector.shape_cast %24 : vector<4x4xf32> to vector<1x4x4xf32>
      tpu.vector_store %arg4[%c0_13, %c0_14, %c0_15], %27 {strides = array<i32>} : memref<1x4x4xf32, #tpu.memory_space<vmem>>, vector<1x4x4xf32>,
    } else {
    }
    return
  }
  func.func @transform_0(%arg0: i32, %arg1: i32) -> i32 {
    %c0_i32 = arith.constant 0 : i32
    %c0_i32_0 = arith.constant 0 : i32
    return %c0_i32 : i32
  }
  func.func @transform_1(%arg0: i32, %arg1: i32) -> (i32, i32, i32) {
    %c0_i32 = arith.constant 0 : i32
    %c0_i32_0 = arith.constant 0 : i32
    return %arg0, %c0_i32, %arg1 : i32, i32, i32
  }
  func.func @transform_2(%arg0: i32, %arg1: i32) -> (i32, i32, i32) {
    %c0_i32 = arith.constant 0 : i32
    %c0_i32_0 = arith.constant 0 : i32
    %c0_i32_1 = arith.constant 0 : i32
    return %arg0, %c0_i32, %c0_i32_0 : i32, i32, i32
  }
}

</mosaic_0001>

<bundles_post_ra>
// kernel: tpu_custom_call.1
= control target key start
LH: loop header
LB: loop body
LE: loop exit
PB: predicated region body
PF: predicated region fallthrough
CT: control target
= control target key end

     0   :  { %s912_s0 = inlined_call_operand.<no memory space> [shape: f32[1], index: 0, kind: input, shape index: {}]   ;;  %s913_s1 = inlined_call_operand.hbm [shape: f32[2,4,256], index: 1, kind: input, shape index: {}]   ;;  %s914_s2 = inlined_call_operand.hbm [shape: f32[2,4,4], index: 2, kind: output, shape index: {}]  }
   0x1   :  { %7 = sst [smem:[#allocation3]] %s912_s0 }
   0x2   :  { %8 = vsyncpa [#allocation5], 0 }
   0x3   :  { %10 = vsyncpa [#allocation5 + $0x1], 0 }
   0x4   :  { %11 = vsyncpa [#allocation6], 0 }
   0x5   :  { %13 = vsyncpa [#allocation6 + $0x1], 0  ;;  %s683_s11 = smov 0   ;;  %s685_s12 = smov 0  }
   0x6   :  { %s687_s13 = smov 0   ;;  %s689_s14 = smov 0  }
   0x7   :  { %s691_s15 = smov 0   ;;  %s693_s16 = smov 0  }
   0x8   :  { %s695_s17 = smov 0   ;;  %s697_s18 = smov 0  }
   0x9   :  { %s699_s0 = smov 0   ;;  %s701_s19 = smov 0  }
   0xa   :  { %s703_s20 = smov 0  }
   0xb LB: > { %s374_s21 = sadd.s32 4294967295, %s658_s20   ;;  %s375_s22 = sadd.s32 4294967294, %s658_s20   ;;  %s658_s20 = sphi %s703_s20, %s19_s20   ;;  %s654_s19 = sphi %s701_s19, %s934_s19   ;;  %s650_s0 = sphi %s699_s0, %s933_s0   ;;  %s646_s18 = sphi %s697_s18, %s932_s18   ;;  %s642_s17 = sphi %s695_s17, %s931_s17   ;;  %s638_s16 = sphi %s693_s16, %s930_s16   ;;  %s634_s15 = sphi %s691_s15, %s929_s15   ;;  %s630_s14 = sphi %s689_s14, %s928_s14   ;;  %s626_s13 = sphi %s687_s13, %s927_s13   ;;  %s622_s12 = sphi %s685_s12, %s926_s12   ;;  %s618_s11 = sphi %s683_s11, %s925_s11  }
   0xc   : > { %s28_s23 = sadd.s32 1, %s650_s0  ;;  %s31_s24 = sadd.s32 1, %s654_s19 }
   0xd   : > { %p29_p0 = scmp.ge.s32.totalorder %s28_s23, 2  ;;  %s61_s25 = sadd.s32 1, %s638_s16 }
   0xe   : > { %p68_p1 = scmp.ne.s32.totalorder %s638_s16, %s634_s15  ;;  %p69_p2 = scmp.eq.s32.totalorder %s658_s20, 0 }
   0xf   : > { %s936_s23 = smov (%p29_p0, %s28_s23), 0  ;;  %s938_s24 = smov (!%p29_p0, %s31_s24), %s654_s19 }
  0x10   : > { %s57_s26 = ssub.s32 %s650_s0, %s936_s23  ;;  %p749_p3 = por %p69_p2, %p68_p1 }
  0x11   : > { %p33_p4 = scmp.ge.s32.totalorder %s938_s24, 2  ;;  %p74_p5 = scmp.ne.s32.totalorder %s634_s15, %s630_s14 }
  0x12   : > { %p75_p6 = scmp.eq.s32.totalorder %s374_s21, 0  ;;  %s87_s28 = sadd.s32 1, %s626_s13 }
  0x13   : > { %s940_s24 = smov (%p33_p4, %s938_s24), 0  ;;  %p97_p8 = scmp.ne.s32.totalorder %s626_s13, %s622_s12 }
  0x14   : > { %p757_p7 = por %p75_p6, %p74_p5  ;;  %s56_s30 = ssub.s32 %s654_s19, %s940_s24 }
  0x15   : > { %p98_p9 = scmp.eq.s32.totalorder %s374_s21, 3  ;;  %s58_s3 = sor.u32 %s57_s26, %s56_s30 }
  0x16   : > { %p85_p10 = scmp.eq.s32.totalorder %s56_s30, 0  ;;  %p59_p11 = scmp.eq.s32.totalorder %s58_s3, 0 }
  0x17   : > { %p765_p12 = por %p98_p9, %p97_p8  ;;  %p103_p13 = scmp.ne.s32.totalorder %s622_s12, %s618_s11 }
  0x18   : > { %s770_s5 = scalar_select %p85_p10, %s626_s13, %s87_s28  }
  0x19   : > { %s918_s4 = scalar_select %p765_p12, 1, 0 }
  0x1a   : > { %s773_s6 = scalar_select %p59_p11, %s638_s16, %s61_s25  }
  0x1b   : > { %p104_p0 = scmp.eq.s32.totalorder %s375_s22, 3  ;;  %p409_p1 = scmp.lt.s32.totalorder %s658_s20, 4 }
  0x1c   : > { %s127_s8 = sand.u32 1, %s638_s16   ;;  %s379_s10 = sshll.u32 %s654_s19, 1 }
  0x1d   : > { %p778_p2 = por %p104_p0, %p103_p13  ;;  %s378_s9 = sshll.u32 %s127_s8, 2 }
  0x1e   : > { %s136_s14 = sadd.s32 %s650_s0, %s379_s10  ;;  %s131_s21 = scalar_lea.vmem [#allocation4], %s378_s9 }
  0x1f   : > { %s919_s7 = scalar_select %p778_p2, 1, 0 }
  0x20   : > { %s140_s26 = sshll.u32 %s131_s21, 4  ;;  %s380_s30 = sshll.u32 %s136_s14, 6  ;;  %s785_s26 = int_to_ptr.vmem [resolvable:$true] %s140_s26 }
  0x21   : > { %s790_s3 = scalar_lea.hbm %s913_s1, %s380_s30  ;;  %p794_p4 = pnand %p409_p1, %p749_p3 }
  0x22   : > { %s128_s9 = scalar_lea.sflag [#allocation5], %s127_s8  ;;  %s506_s10 = scalar_lea.hbm %s790_s3, 64 }
  0x23   : > { %p507_p8 = scmp.ne.s32.totalorder %s790_s3, %s506_s10  ;;  %p508_p9 = pneg %p794_p4 }
  0x24   : > { %s511_s21 = scalar_lea.hbm %s913_s1, 256  ;;  %p512_p3 = scmp.lt.u32.totalorder %s790_s3, %s913_s1 }
  0x25   : > { %p509_p10 = pnand %p508_p9, %p507_p8  ;;  %p513_p13 = scmp.lt.u32.totalorder %s511_s21, %s506_s10 }
  0x26   : > { %p515_p1 = scmp.lt.u32.totalorder %s506_s10, %s790_s3 }
  0x27   : > { %p510_p11 = pneg %p509_p10  ;;  %p514_p0 = por %p513_p13, %p512_p3 }
  0x29   : > { %p516_p5 = por %p515_p1, %p514_p0 }
  0x2b   : > { %p517_p6 = pnand %p516_p5, %p510_p11 }
  0x2d   : > { %520 = shalt.err (!%p517_p6)
}
  0x2e   : > { %s521_s8 = scalar_lea.vmem %s785_s26, 64  ;;  %s660_s25 = smov [#allocation4]  }
  0x2f   : > { %p522_p8 = scmp.ne.s32.totalorder %s785_s26, %s521_s8  ;;  %s526_s27 = sshll.u32 %s660_s25, 4  ;;  %s527_s27 = int_to_ptr.vmem [resolvable:$false] %s526_s27 }
  0x30   : > { %s528_s14 = scalar_lea.vmem %s527_s27, 128  ;;  %p529_p12 = scmp.lt.s32.totalorder %s785_s26, %s527_s27 }
  0x31   : > { %p524_p10 = pnand %p522_p8, %p508_p9  ;;  %p530_p3 = scmp.lt.s32.totalorder %s528_s14, %s521_s8 }
  0x33   : > { %p525_p2 = pneg %p524_p10  ;;  %p531_p13 = por %p530_p3, %p529_p12 }
  0x35   : > { %p532_p0 = pnand %p531_p13, %p525_p2 }
  0x37   : > { %535 = shalt.err (!%p532_p0)
}
  0x38   : > { %404 = dma.hbm_to_vmem [thread:$0]  (!%p794_p4), %s790_s3, 64, %s785_s26, %s128_s9  }
  0x39   : > { %p921_p5 = scmp.lt.s32.totalorder %s658_s20, 5  ;;  %p922_p6 = scmp.ge.s32.totalorder %s658_s20, 1 }
  0x3b   : > { %p146_p9 = pnand %p922_p6, %p921_p5 }
  0x3c   : > { %s151_s10 = sand.u32 (!%p146_p9), 1, %s634_s15  }
  0x3d   : > { %149 = sbr.rel (%p146_p9) target bundleno = 647 (0x287), region = 28  ;;  %s382_s21 = sshll.u32 (!%p146_p9), %s151_s10, 2 }
  0x3e   : > { %s152_s30 = scalar_lea.sflag (!%p146_p9), [#allocation5], %s151_s10  ;;  %s155_s28 = scalar_lea.vmem (!%p146_p9), [#allocation4], %s382_s21 }
  0x44   : > { %609 = dma.done.wait (%p757_p7), %s152_s30, 64  }
  0x45   : > { %611 = vsyncadd (%p757_p7), %s152_s30, 4294967232  ;;  %s173_s22 = sand.u32 1, %s622_s12   ;;  %p384_p12 = scmp.ne.s32.totalorder %s642_s17, 0 }
  0x46   : > { %s837_s26 = sshll.u32 %s173_s22, 2  ;;  %vm180_vm0 = vcmask (!%p384_p12), 27648   ;;  %v661_v0 = vmov (!%p384_p12), 0.0  }
  0x47   : > { %s175_s3 = scalar_lea.vmem [#allocation7], %s837_s26  ;;  %179 = sbr.rel (%p384_p12) target bundleno = 78 (0x4e), region = 36  ;;  %181 = vst.msk [vmem:[#allocation2] sm:$0xf] (!%p384_p12), %vm180_vm0, %v661_v0 }
  0x4e PF: > { %v182_v1 = vld [vmem:[%s155_s28] sm:$0xf]  ;;  %v662_v2 = vmov 0.0   ;;  %vm663_vm1 = vmmov 0   ;;  %v183_v3 = vld [vmem:[#allocation2] sm:$0xf] }
  0x4f   : > { %392 = vmatprep.subr.mxu0 %v662_v2  ;;  %394 = vmatprep.mubr.msk.f32.mxu0 %vm663_vm1, %v662_v2  ;;  %vm255_vm2 = vcmask 27648   ;;  %p385_p7 = scmp.ne.s32.totalorder %s642_s17, 1 }
  0x50   : > { %393 = vmatpush3.xpose.msra.mxu0 %v182_v1  ;;  %s261_s29 = sld [smem:[#allocation3]] (!%p385_p7) }
  0x53   : > { %395 = vmatmul.mubr.f32.vlgmr.msra.gmra.mrb[0].mxu0 %v182_v1 }
  0x56   : > { %v272_v15 = vstv (!%p385_p7), %s261_s29 }
 0x123   : > { %260 = sbr.rel (%p385_p7) target bundleno = 622 (0x26e), region = 40 }
 0x126   : > { %v250_v4 = vpop.f32.mrb[0].mxu0 }
 0x127   : > { %v254_v5 = vadd.f32 %v250_v4, %v183_v3  ;;  %v396_v6 = vpop.f32.mrb[1].mxu0 }
 0x129   : > { %256 = vst.msk [vmem:[#allocation2] sm:$0xf] %vm255_vm2, %v254_v5 }
 0x130   : > { %v262_v7 = vld [vmem:[#allocation2] sm:$0xf] }
 0x131   : > { %v263_v8 = vsel %vm255_vm2, %v262_v7, inf }
 0x132   : > { %264 = vmin.xlane.f32.xlu0 %v263_v8 }
 0x1bf   : > { %v265_v9 = vpop.xlane.xlu0 %264 }
 0x1c0   : > { %v266_v10 = vsub.f32 %v265_v9, %v262_v7 }
 0x1c2   : > { %v267_v11 = vmul.f32 1.442695, %v266_v10 }
 0x1c4   : > { %502 = vpow2.f32 %v267_v11 }
 0x1ce   : > { %v503_v12 = vpop.eup %502 }
 0x1cf   : > { %v269_v13 = vsel %vm255_vm2, %v503_v12, 0.0 }
 0x1d0   : > { %270 = vadd.xlane.f32.xlu0 %v269_v13 }
 0x25d   : > { %v271_v14 = vpop.xlane.xlu0 %270 }
 0x25e   : > { %504 = vrcp.f32 %v271_v14 }
 0x268   : > { %v505_v16 = vpop.eup %504 }
 0x269   : > { %v274_v17 = vmul.f32 %v505_v16, %v272_v15 }
 0x26b   : > { %v275_v18 = vmul.f32 %v503_v12, %v274_v17 }
 0x26d   : > { %276 = vst.msk [vmem:[%s175_s3] sm:$0xf] %vm255_vm2, %v275_v18 }
 0x26e PF: > { %s387_s17 = sshll.u32 %s646_s18, 6  ;;  %s291_s27 = sshll.u32 %s175_s3, 4  ;;  %s292_s27 = int_to_ptr.vmem [resolvable:$true] %s291_s27 }
 0x26f   : > { %s852_s25 = scalar_lea.hbm %s914_s2, %s387_s17  ;;  %s278_s14 = scalar_lea.sflag [#allocation6], %s173_s22 }
 0x270   : > { %s536_s10 = scalar_lea.vmem %s292_s27, 64  ;;  %p923_p4 = scmp.ne.s32.totalorder %s918_s4, 0 }
 0x271   : > { %p537_p2 = scmp.ne.s32.totalorder %s292_s27, %s536_s10  ;;  %s664_s21 = smov [#allocation7]  }
 0x272   : > { %s540_s30 = sshll.u32 %s664_s21, 4  ;;  %s541_s30 = int_to_ptr.vmem [resolvable:$false] %s540_s30 }
 0x273   : > { %p538_p11 = pnand %p537_p2, %p923_p4  ;;  %s542_s28 = scalar_lea.vmem %s541_s30, 128 }
 0x274   : > { %p543_p8 = scmp.lt.s32.totalorder %s292_s27, %s541_s30  ;;  %p544_p10 = scmp.lt.s32.totalorder %s542_s28, %s536_s10 }
 0x275   : > { %p539_p1 = pneg %p538_p11 }
 0x276   : > { %p545_p3 = por %p544_p10, %p543_p8 }
 0x278   : > { %p546_p13 = pnand %p545_p3, %p539_p1 }
 0x27a   : > { %549 = shalt.err (!%p546_p13)
}
 0x27b   : > { %s550_s18 = scalar_lea.hbm %s852_s25, 64  ;;  %s554_s3 = scalar_lea.hbm %s914_s2, 128 }
 0x27c   : > { %p551_p0 = scmp.ne.s32.totalorder %s852_s25, %s550_s18  ;;  %p555_p9 = scmp.lt.u32.totalorder %s852_s25, %s914_s2 }
 0x27d   : > { %p556_p12 = scmp.lt.u32.totalorder %s554_s3, %s550_s18  ;;  %p558_p2 = scmp.lt.u32.totalorder %s550_s18, %s852_s25 }
 0x27e   : > { %p552_p5 = pnand %p551_p0, %p923_p4 }
 0x27f   : > { %p557_p7 = por %p556_p12, %p555_p9 }
 0x280   : > { %p553_p6 = pneg %p552_p5 }
 0x281   : > { %p559_p11 = por %p558_p2, %p557_p7 }
 0x283   : > { %p560_p1 = pnand %p559_p11, %p553_p6 }
 0x285   : > { %563 = shalt.err (!%p560_p1)
}
 0x286   : > { %399 = dma.vmem_to_hbm [thread:$0]  (%p923_p4), %s292_s27, 64, %s852_s25, %s278_s14  }
 0x287 PF: > { %p410_p8 = scmp.ge.s32.totalorder %s658_s20, 2  ;;  %s303_s9 = sand.u32 1, %s618_s11  }
 0x288   : > { %p924_p10 = scmp.ne.s32.totalorder %s919_s7, 0  ;;  %s304_s8 = scalar_lea.sflag [#allocation6], %s303_s9 }
 0x28a   : > { %p406_p3 = pnand %p410_p8, %p924_p10 }
 0x28c   : > { %613 = dma.done.wait (!%p406_p3), %s304_s8, 64  }
 0x28d   : > { %615 = vsyncadd (!%p406_p3), %s304_s8, 4294967232  ;;  %s19_s20 = sadd.s32 1, %s658_s20   ;;  %s925_s11 = smov %s622_s12 }
 0x28e   : > { %p16_p13 = scmp.ge.s32.totalorder %s19_s20, 6   ;;  %s926_s12 = smov %s626_s13 }
 0x28f   : > { %s927_s13 = smov %s770_s5  ;;  %s928_s14 = smov %s634_s15 }
 0x290   : > { %s929_s15 = smov %s638_s16  ;;  %s930_s16 = smov %s773_s6 }
 0x291   : > { %s931_s17 = smov %s650_s0  ;;  %s932_s18 = smov %s654_s19 }
 0x292   : > { %s933_s0 = smov %s936_s23  ;;  %s934_s19 = smov %s940_s24 }
 0x293   :  { %18 = sbr.rel (!%p16_p13) target bundleno = 11 (0xb), region = 81 }
 0x29a   :  { %309 = vsyncpa [#allocation5], 1 }
 0x29b   :  { %311 = vsyncpa [#allocation5 + $0x1], 1 }
 0x29c   :  { %312 = vsyncpa [#allocation6], 1 }
 0x29d   :  { %314 = vsyncpa [#allocation6 + $0x1], 1 }

</bundles_post_ra>
